<compile_context>
chip_gen: v7x
topology: tpu7x:2x2x1
jax: 0.10.0
libtpu: 0.0.40
codegen_flags: <defaults>
</compile_context>

<pallas_src>
import jax
import jax.numpy as jnp
from jax.experimental import pallas as pl
from jax.experimental.pallas import tpu as pltpu


# ----------------------------------------------------------------------------
# Pallas kernel: fused two-head critic MLP (2 hidden ReLU layers + linear head)
# ----------------------------------------------------------------------------
def _sac_critic_kernel(lat_ref, act_ref,
                       w1_ref, b1_ref,
                       w2a_ref, b2a_ref, w2b_ref, b2b_ref,
                       w3a_ref, w3b_ref, b3_ref,
                       q_ref,
                       x_scr):
    d_lat = lat_ref.shape[1]
    H = w2a_ref.shape[0]

    # In-kernel concat into a VMEM scratch -> single K=(d_lat+d_act) MXU dot
    # (one LHS streaming pass instead of two tiny-K passes).
    x_scr[:, :d_lat] = lat_ref[...]
    x_scr[:, d_lat:] = act_ref[...]

    # Layer 1 (shared across the two heads): bf16 MXU dot, f32 accumulate.
    h = jnp.dot(x_scr[...], w1_ref[...], preferred_element_type=jnp.float32)
    h = jnp.maximum(h + b1_ref[...], 0.0)                      # (TM, 2H) f32

    # Layer 2: un-fused heads -> two (TM,H)@(H,H) dots (no zero-block MACs).
    h1 = h[:, :H].astype(w2a_ref.dtype)
    h2 = h[:, H:].astype(w2b_ref.dtype)
    g1 = jnp.dot(h1, w2a_ref[...], preferred_element_type=jnp.float32)
    g1 = jnp.maximum(g1 + b2a_ref[...], 0.0)
    g2 = jnp.dot(h2, w2b_ref[...], preferred_element_type=jnp.float32)
    g2 = jnp.maximum(g2 + b2b_ref[...], 0.0)

    # Layer 3 (1 output column per head) on the VPU/XLU instead of the MXU:
    # a 2-column MXU dot would still burn a full LHS streaming pass.
    q1 = jnp.sum(g1 * w3a_ref[...], axis=-1, keepdims=True)    # (TM, 1)
    q2 = jnp.sum(g2 * w3b_ref[...], axis=-1, keepdims=True)    # (TM, 1)
    q_ref[...] = jnp.concatenate([q1, q2], axis=1) + b3_ref[...]


def _round_up(x, m):
    return (x + m - 1) // m * m


def sac_critic_pallas(latent2d, action2d, fused_params):
    """latent2d: (N, input_size), action2d: (N, action_size).
    fused_params: output of fuse_critic_params() (precomputed, hoisted).
    Returns q: (N, 2) float32 with q1 = q[:, 0], q2 = q[:, 1]."""
    N, d_lat = latent2d.shape
    d_act = action2d.shape[1]
    d_in = d_lat + d_act
    w1, b1, w2a, b2a, w2b, b2b, w3a_row, w3b_row, b3 = fused_params
    H = w2a.shape[0]

    # bf16 inputs for the MXU's native path (accumulation stays f32 in-kernel).
    lat = latent2d.astype(jnp.bfloat16)
    act = action2d.astype(jnp.bfloat16)

    # Batch tile: multiple of 16 (bf16 sublane packing); sized so realistic
    # batches get >= 2 grid steps (both v7x TensorCores), capped at 512 rows.
    TM = max(16, min(512, _round_up(pl.cdiv(max(N, 1), 2), 16)))
    n_pad = _round_up(N, TM)
    if n_pad != N:
        lat = jnp.pad(lat, ((0, n_pad - N), (0, 0)))
        act = jnp.pad(act, ((0, n_pad - N), (0, 0)))
    grid = (n_pad // TM,)

    def batch_spec(cols):
        return pl.BlockSpec((TM, cols), lambda i: (i, 0))

    def resident_spec(arr):
        # Constant block index -> DMA'd once, stays VMEM-resident across steps.
        return pl.BlockSpec(arr.shape, lambda i: (0, 0))

    cost = pl.CostEstimate(
        flops=2 * n_pad * (d_in * 2 * H + 2 * H * H + 2 * H),
        transcendentals=0,
        bytes_accessed=(2 * n_pad * d_in + 4 * n_pad * 2
                        + sum(int(p.size) * p.dtype.itemsize
                              for p in fused_params)),
    )

    q = pl.pallas_call(
        _sac_critic_kernel,
        out_shape=jax.ShapeDtypeStruct((n_pad, 2), jnp.float32),
        grid=grid,
        in_specs=[
            batch_spec(d_lat),
            batch_spec(d_act),
            resident_spec(w1), resident_spec(b1),
            resident_spec(w2a), resident_spec(b2a),
            resident_spec(w2b), resident_spec(b2b),
            resident_spec(w3a_row), resident_spec(w3b_row),
            resident_spec(b3),
        ],
        out_specs=pl.BlockSpec((TM, 2), lambda i: (i, 0)),
        scratch_shapes=[pltpu.VMEM((TM, d_in), jnp.bfloat16)],
        compiler_params=pltpu.CompilerParams(
            dimension_semantics=("parallel",)),
        cost_estimate=cost,
    )(lat, act, w1, b1, w2a, b2a, w2b, b2b, w3a_row, w3b_row, b3)
    return q[:N]


# ----------------------------------------------------------------------------
# Head fusion (hoisted; call once per parameter update, NOT per forward).
# Layer 1 weights concatenated (shared x), layers 2/3 kept per-head (no zero
# blocks).  MXU operands pre-cast to bf16; the tiny layer-3 rows stay f32 for
# the VPU.
# ----------------------------------------------------------------------------
def fuse_critic_params(params1, params2):
    w1a, b1a, w2a, b2a, w3a, b3a = params1
    w1b, b1b, w2b, b2b, w3b, b3b = params2
    w1 = jnp.concatenate([w1a, w1b], axis=1).astype(jnp.bfloat16)  # (Din, 2H)
    b1 = jnp.concatenate([b1a, b1b], axis=1)                       # (1, 2H) f32
    w3a_row = jnp.transpose(w3a)                                   # (1, H) f32
    w3b_row = jnp.transpose(w3b)                                   # (1, H) f32
    b3 = jnp.concatenate([b3a, b3b], axis=1)                       # (1, 2) f32
    return (w1, b1,
            w2a.astype(jnp.bfloat16), b2a,
            w2b.astype(jnp.bfloat16), b2b,
            w3a_row, w3b_row, b3)


# ----------------------------------------------------------------------------
# Parameter init (mirrors rlpyt weight_init: orthogonal W, zero bias)
# ----------------------------------------------------------------------------
def _orthogonal(key, in_dim, out_dim):
    a = jax.random.normal(key, (max(in_dim, out_dim), min(in_dim, out_dim)),
                          dtype=jnp.float32)
    q, r = jnp.linalg.qr(a)
    q = q * jnp.sign(jnp.diag(r))
    w = q if q.shape == (in_dim, out_dim) else q.T
    return w.astype(jnp.float32)


def make_mlp_params(key, in_dim, hidden_sizes, out_dim):
    dims = [in_dim] + list(hidden_sizes) + [out_dim]
    params = []
    keys = jax.random.split(key, len(dims) - 1)
    for k, d_in, d_out in zip(keys, dims[:-1], dims[1:]):
        params.append(_orthogonal(k, d_in, d_out))          # weight (in, out)
        params.append(jnp.zeros((1, d_out), jnp.float32))   # bias
    return tuple(params)


# ----------------------------------------------------------------------------
# Leading-dim helpers (infer_leading_dims / restore_leading_dims semantics)
# ----------------------------------------------------------------------------
def infer_leading_dims(x, dim):
    lead_dim = x.ndim - dim
    assert lead_dim in (0, 1, 2)
    if lead_dim == 2:
        T, B = x.shape[:2]
    elif lead_dim == 1:
        T, B = 1, x.shape[0]
    else:
        T, B = 1, 1
    return lead_dim, T, B, x.shape[lead_dim:]


def restore_leading_dims(tensors, lead_dim, T, B):
    def restore(t):
        if lead_dim == 2:
            return t.reshape((T, B) + t.shape[1:])
        if lead_dim == 1:
            return t                        # already (B, ...)
        return t.reshape(t.shape[1:])       # drop the B=1 axis
    return tuple(restore(t) for t in tensors)


# ----------------------------------------------------------------------------
# Module-equivalent forward (fused params are precomputed and passed in)
# ----------------------------------------------------------------------------
def sac_critic_forward(latent, action, fused_params):
    lead_dim, T, B, _ = infer_leading_dims(latent, 1)
    lat2d = latent.reshape(T * B, -1)
    act2d = action.reshape(T * B, -1)
    q = sac_critic_pallas(lat2d, act2d, fused_params)      # (N, 2)
    q1, q2 = q[:, 0], q[:, 1]
    q1, q2 = restore_leading_dims((q1, q2), lead_dim, T, B)
    return q1, q2


if __name__ == "__main__":
    key = jax.random.PRNGKey(0)
    k_lat, k_act, k_p1, k_p2 = jax.random.split(key, 4)

    # Small shapes consistent with the module: (T, B, input_size) latent,
    # (T, B, action_size) action.
    T, B = 2, 4
    input_size, action_size = 32, 8
    hidden_sizes = (32, 32)

    latent = jax.random.normal(k_lat, (T, B, input_size), dtype=jnp.float32)
    action = jax.random.normal(k_act, (T, B, action_size), dtype=jnp.float32)

    params1 = make_mlp_params(k_p1, input_size + action_size, hidden_sizes, 1)
    params2 = make_mlp_params(k_p2, input_size + action_size, hidden_sizes, 1)

    # Hoisted: fuse once per parameter update, not inside every forward call.
    fused = fuse_critic_params(params1, params2)

    forward = jax.jit(sac_critic_forward)
    q1, q2 = forward(latent, action, fused)
    jax.block_until_ready((q1, q2))

    assert q1.shape == (T, B) and q2.shape == (T, B)

    # Pure-JAX reference (concat-based, like the PyTorch module), with matching
    # bf16 matmul operands + f32 accumulation.
    x = jnp.concatenate([latent.reshape(T * B, -1), action.reshape(T * B, -1)],
                        axis=1)

    def ref_mlp(x, p):
        w1, b1, w2, b2, w3, b3 = p
        h = jnp.dot(x.astype(jnp.bfloat16), w1.astype(jnp.bfloat16),
                    preferred_element_type=jnp.float32) + b1
        h = jnp.maximum(h, 0.0)
        h = jnp.dot(h.astype(jnp.bfloat16), w2.astype(jnp.bfloat16),
                    preferred_element_type=jnp.float32) + b2
        h = jnp.maximum(h, 0.0)
        return h @ w3 + b3

    r1 = ref_mlp(x, params1).squeeze(-1).reshape(T, B)
    r2 = ref_mlp(x, params2).squeeze(-1).reshape(T, B)
    assert jnp.allclose(q1, r1, atol=1e-2, rtol=1e-2)
    assert jnp.allclose(q2, r2, atol=1e-2, rtol=1e-2)

    print("KERNEL_OK")
</pallas_src>

<mosaic_0001>
module attributes {stable_mosaic.version = 11 : i64} {
  func.func @_sac_critic_kernel(%arg0: i32, %arg1: memref<16x32xbf16, #tpu.memory_space<vmem>>, %arg2: memref<16x8xbf16, #tpu.memory_space<vmem>>, %arg3: memref<40x64xbf16, #tpu.memory_space<vmem>>, %arg4: memref<1x64xf32, #tpu.memory_space<vmem>>, %arg5: memref<32x32xbf16, #tpu.memory_space<vmem>>, %arg6: memref<1x32xf32, #tpu.memory_space<vmem>>, %arg7: memref<32x32xbf16, #tpu.memory_space<vmem>>, %arg8: memref<1x32xf32, #tpu.memory_space<vmem>>, %arg9: memref<1x32xf32, #tpu.memory_space<vmem>>, %arg10: memref<1x32xf32, #tpu.memory_space<vmem>>, %arg11: memref<1x2xf32, #tpu.memory_space<vmem>>, %arg12: memref<16x2xf32, #tpu.memory_space<vmem>>, %arg13: memref<16x40xbf16, #tpu.memory_space<vmem>>) attributes {dimension_semantics = [#tpu.dimension_semantics<parallel>], iteration_bounds = array<i64: 1>, scalar_prefetch = 0 : i64, scratch_operands = 1 : i64, tpu.core_type = #tpu.core_type<tc>, window_params = [{transform_indices = @transform_0, window_bounds = array<i64: 16, 32>}, {transform_indices = @transform_1, window_bounds = array<i64: 16, 8>}, {pipeline_mode = #tpu.pipeline_mode<synchronous>, transform_indices = @transform_2, window_bounds = array<i64: 40, 64>}, {pipeline_mode = #tpu.pipeline_mode<synchronous>, transform_indices = @transform_3, window_bounds = array<i64: 1, 64>}, {pipeline_mode = #tpu.pipeline_mode<synchronous>, transform_indices = @transform_4, window_bounds = array<i64: 32, 32>}, {pipeline_mode = #tpu.pipeline_mode<synchronous>, transform_indices = @transform_5, window_bounds = array<i64: 1, 32>}, {pipeline_mode = #tpu.pipeline_mode<synchronous>, transform_indices = @transform_6, window_bounds = array<i64: 32, 32>}, {pipeline_mode = #tpu.pipeline_mode<synchronous>, transform_indices = @transform_7, window_bounds = array<i64: 1, 32>}, {pipeline_mode = #tpu.pipeline_mode<synchronous>, transform_indices = @transform_8, window_bounds = array<i64: 1, 32>}, {pipeline_mode = #tpu.pipeline_mode<synchronous>, transform_indices = @transform_9, window_bounds = array<i64: 1, 32>}, {pipeline_mode = #tpu.pipeline_mode<synchronous>, transform_indices = @transform_10, window_bounds = array<i64: 1, 2>}, {transform_indices = @transform_11, window_bounds = array<i64: 16, 2>}]} {
    %c0 = arith.constant 0 : index
    %c0_0 = arith.constant 0 : index
    %0 = vector.load %arg1[%c0, %c0_0] : memref<16x32xbf16, #tpu.memory_space<vmem>>, vector<16x32xbf16>
    %c0_1 = arith.constant 0 : index
    %c0_2 = arith.constant 0 : index
    %1 = vector.load %arg13[%c0_1, %c0_2] : memref<16x40xbf16, #tpu.memory_space<vmem>>, vector<16x32xbf16>
    tpu.vector_store %arg13[%c0_1, %c0_2], %0 {strides = array<i32>} : memref<16x40xbf16, #tpu.memory_space<vmem>>, vector<16x32xbf16>,
    %c0_3 = arith.constant 0 : index
    %c0_4 = arith.constant 0 : index
    %2 = vector.load %arg2[%c0_3, %c0_4] : memref<16x8xbf16, #tpu.memory_space<vmem>>, vector<16x8xbf16>
    %c0_5 = arith.constant 0 : index
    %c32 = arith.constant 32 : index
    %3 = vector.load %arg13[%c0_5, %c32] : memref<16x40xbf16, #tpu.memory_space<vmem>>, vector<16x8xbf16>
    tpu.vector_store %arg13[%c0_5, %c32], %2 {strides = array<i32>} : memref<16x40xbf16, #tpu.memory_space<vmem>>, vector<16x8xbf16>,
    %c0_6 = arith.constant 0 : index
    %c0_7 = arith.constant 0 : index
    %4 = vector.load %arg13[%c0_6, %c0_7] : memref<16x40xbf16, #tpu.memory_space<vmem>>, vector<16x40xbf16>
    %c0_8 = arith.constant 0 : index
    %c0_9 = arith.constant 0 : index
    %5 = vector.load %arg3[%c0_8, %c0_9] : memref<40x64xbf16, #tpu.memory_space<vmem>>, vector<40x64xbf16>
    %cst = arith.constant dense<0.000000e+00> : vector<16x64xf32>
    %6 = tpu.matmul %4, %5, %cst {dimension_numbers = #tpu.dot_dimension_numbers<[1], [0], [0], [1], [0, 0, 1, 1], [], []>} : vector<16x40xbf16>, vector<40x64xbf16>, vector<16x64xf32> -> vector<16x64xf32>
    %c0_10 = arith.constant 0 : index
    %c0_11 = arith.constant 0 : index
    %7 = vector.load %arg4[%c0_10, %c0_11] : memref<1x64xf32, #tpu.memory_space<vmem>>, vector<1x64xf32>
    %8 = vector.broadcast %7 : vector<1x64xf32> to vector<16x64xf32>
    %9 = arith.addf %6, %8 : vector<16x64xf32>
    %cst_12 = arith.constant 0.000000e+00 : f32
    %10 = vector.broadcast %cst_12 : f32 to vector<16x64xf32>
    %11 = arith.maximumf %9, %10 : vector<16x64xf32>
    %12 = vector.extract_strided_slice %11 {offsets = [0, 0], sizes = [16, 32], strides = [1, 1]} : vector<16x64xf32> to vector<16x32xf32>
    %13 = arith.truncf %12 : vector<16x32xf32> to vector<16x32xbf16>
    %14 = vector.extract_strided_slice %11 {offsets = [0, 32], sizes = [16, 32], strides = [1, 1]} : vector<16x64xf32> to vector<16x32xf32>
    %15 = arith.truncf %14 : vector<16x32xf32> to vector<16x32xbf16>
    %c0_13 = arith.constant 0 : index
    %c0_14 = arith.constant 0 : index
    %16 = vector.load %arg5[%c0_13, %c0_14] : memref<32x32xbf16, #tpu.memory_space<vmem>>, vector<32x32xbf16>
    %cst_15 = arith.constant dense<0.000000e+00> : vector<16x32xf32>
    %17 = tpu.matmul %13, %16, %cst_15 {dimension_numbers = #tpu.dot_dimension_numbers<[1], [0], [0], [1], [0, 0, 1, 1], [], []>} : vector<16x32xbf16>, vector<32x32xbf16>, vector<16x32xf32> -> vector<16x32xf32>
    %c0_16 = arith.constant 0 : index
    %c0_17 = arith.constant 0 : index
    %18 = vector.load %arg6[%c0_16, %c0_17] : memref<1x32xf32, #tpu.memory_space<vmem>>, vector<1x32xf32>
    %19 = vector.broadcast %18 : vector<1x32xf32> to vector<16x32xf32>
    %20 = arith.addf %17, %19 : vector<16x32xf32>
    %cst_18 = arith.constant 0.000000e+00 : f32
    %21 = vector.broadcast %cst_18 : f32 to vector<16x32xf32>
    %22 = arith.maximumf %20, %21 : vector<16x32xf32>
    %c0_19 = arith.constant 0 : index
    %c0_20 = arith.constant 0 : index
    %23 = vector.load %arg7[%c0_19, %c0_20] : memref<32x32xbf16, #tpu.memory_space<vmem>>, vector<32x32xbf16>
    %cst_21 = arith.constant dense<0.000000e+00> : vector<16x32xf32>
    %24 = tpu.matmul %15, %23, %cst_21 {dimension_numbers = #tpu.dot_dimension_numbers<[1], [0], [0], [1], [0, 0, 1, 1], [], []>} : vector<16x32xbf16>, vector<32x32xbf16>, vector<16x32xf32> -> vector<16x32xf32>
    %c0_22 = arith.constant 0 : index
    %c0_23 = arith.constant 0 : index
    %25 = vector.load %arg8[%c0_22, %c0_23] : memref<1x32xf32, #tpu.memory_space<vmem>>, vector<1x32xf32>
    %26 = vector.broadcast %25 : vector<1x32xf32> to vector<16x32xf32>
    %27 = arith.addf %24, %26 : vector<16x32xf32>
    %cst_24 = arith.constant 0.000000e+00 : f32
    %28 = vector.broadcast %cst_24 : f32 to vector<16x32xf32>
    %29 = arith.maximumf %27, %28 : vector<16x32xf32>
    %c0_25 = arith.constant 0 : index
    %c0_26 = arith.constant 0 : index
    %30 = vector.load %arg9[%c0_25, %c0_26] : memref<1x32xf32, #tpu.memory_space<vmem>>, vector<1x32xf32>
    %31 = vector.broadcast %30 : vector<1x32xf32> to vector<16x32xf32>
    %32 = arith.mulf %22, %31 : vector<16x32xf32>
    %cst_27 = arith.constant dense<0.000000e+00> : vector<16xf32>
    %33 = vector.multi_reduction <add>, %32, %cst_27 [1] : vector<16x32xf32> to vector<16xf32>
    %34 = vector.shape_cast %33 : vector<16xf32> to vector<16x1xf32>
    %c0_28 = arith.constant 0 : index
    %c0_29 = arith.constant 0 : index
    %35 = vector.load %arg10[%c0_28, %c0_29] : memref<1x32xf32, #tpu.memory_space<vmem>>, vector<1x32xf32>
    %36 = vector.broadcast %35 : vector<1x32xf32> to vector<16x32xf32>
    %37 = arith.mulf %29, %36 : vector<16x32xf32>
    %cst_30 = arith.constant dense<0.000000e+00> : vector<16xf32>
    %38 = vector.multi_reduction <add>, %37, %cst_30 [1] : vector<16x32xf32> to vector<16xf32>
    %39 = vector.shape_cast %38 : vector<16xf32> to vector<16x1xf32>
    %40 = tpu.concatenate %34, %39 in 1 : vector<16x1xf32>, vector<16x1xf32> -> vector<16x2xf32>
    %c0_31 = arith.constant 0 : index
    %c0_32 = arith.constant 0 : index
    %41 = vector.load %arg11[%c0_31, %c0_32] : memref<1x2xf32, #tpu.memory_space<vmem>>, vector<1x2xf32>
    %42 = vector.broadcast %41 : vector<1x2xf32> to vector<16x2xf32>
    %43 = arith.addf %40, %42 : vector<16x2xf32>
    %c0_33 = arith.constant 0 : index
    %c0_34 = arith.constant 0 : index
    %44 = vector.load %arg12[%c0_33, %c0_34] : memref<16x2xf32, #tpu.memory_space<vmem>>, vector<16x2xf32>
    tpu.vector_store %arg12[%c0_33, %c0_34], %43 {strides = array<i32>} : memref<16x2xf32, #tpu.memory_space<vmem>>, vector<16x2xf32>,
    return
  }
  func.func @transform_0(%arg0: i32) -> (i32, i32) {
    %c0_i32 = arith.constant 0 : i32
    %c0_i32_0 = arith.constant 0 : i32
    return %arg0, %c0_i32 : i32, i32
  }
  func.func @transform_1(%arg0: i32) -> (i32, i32) {
    %c0_i32 = arith.constant 0 : i32
    %c0_i32_0 = arith.constant 0 : i32
    return %arg0, %c0_i32 : i32, i32
  }
  func.func @transform_2(%arg0: i32) -> (i32, i32) {
    %c0_i32 = arith.constant 0 : i32
    %c0_i32_0 = arith.constant 0 : i32
    %c0_i32_1 = arith.constant 0 : i32
    return %c0_i32, %c0_i32_0 : i32, i32
  }
  func.func @transform_3(%arg0: i32) -> (i32, i32) {
    %c0_i32 = arith.constant 0 : i32
    %c0_i32_0 = arith.constant 0 : i32
    %c0_i32_1 = arith.constant 0 : i32
    return %c0_i32, %c0_i32_0 : i32, i32
  }
  func.func @transform_4(%arg0: i32) -> (i32, i32) {
    %c0_i32 = arith.constant 0 : i32
    %c0_i32_0 = arith.constant 0 : i32
    %c0_i32_1 = arith.constant 0 : i32
    return %c0_i32, %c0_i32_0 : i32, i32
  }
  func.func @transform_5(%arg0: i32) -> (i32, i32) {
    %c0_i32 = arith.constant 0 : i32
    %c0_i32_0 = arith.constant 0 : i32
    %c0_i32_1 = arith.constant 0 : i32
    return %c0_i32, %c0_i32_0 : i32, i32
  }
  func.func @transform_6(%arg0: i32) -> (i32, i32) {
    %c0_i32 = arith.constant 0 : i32
    %c0_i32_0 = arith.constant 0 : i32
    %c0_i32_1 = arith.constant 0 : i32
    return %c0_i32, %c0_i32_0 : i32, i32
  }
  func.func @transform_7(%arg0: i32) -> (i32, i32) {
    %c0_i32 = arith.constant 0 : i32
    %c0_i32_0 = arith.constant 0 : i32
    %c0_i32_1 = arith.constant 0 : i32
    return %c0_i32, %c0_i32_0 : i32, i32
  }
  func.func @transform_8(%arg0: i32) -> (i32, i32) {
    %c0_i32 = arith.constant 0 : i32
    %c0_i32_0 = arith.constant 0 : i32
    %c0_i32_1 = arith.constant 0 : i32
    return %c0_i32, %c0_i32_0 : i32, i32
  }
  func.func @transform_9(%arg0: i32) -> (i32, i32) {
    %c0_i32 = arith.constant 0 : i32
    %c0_i32_0 = arith.constant 0 : i32
    %c0_i32_1 = arith.constant 0 : i32
    return %c0_i32, %c0_i32_0 : i32, i32
  }
  func.func @transform_10(%arg0: i32) -> (i32, i32) {
    %c0_i32 = arith.constant 0 : i32
    %c0_i32_0 = arith.constant 0 : i32
    %c0_i32_1 = arith.constant 0 : i32
    return %c0_i32, %c0_i32_0 : i32, i32
  }
  func.func @transform_11(%arg0: i32) -> (i32, i32) {
    %c0_i32 = arith.constant 0 : i32
    %c0_i32_0 = arith.constant 0 : i32
    return %arg0, %c0_i32 : i32, i32
  }
}

</mosaic_0001>

<bundles_post_ra>
// kernel: squeeze.3
= control target key start
LH: loop header
LB: loop body
LE: loop exit
PB: predicated region body
PF: predicated region fallthrough
CT: control target
= control target key end

     0   :  { %s85_s0 = inlined_call_operand.vmem [shape: f32[8], index: 0, kind: input, shape index: {}]   ;;  %s86_s1 = inlined_call_operand.hbm [shape: f32[2,4], index: 1, kind: output, shape index: {}]  }
   0x1   :  { %v5_v0 = vld [vmem:[%s85_s0] sm:$0x1] }
   0x2   :  { %2 = vsyncpa [#allocation1], 0  ;;  %6 = vst [vmem:[#allocation3] sm:$0x1] %v5_v0  ;;  %vm8_vm0 = vcmask 31744   ;;  %s58_s0 = smov 124  }
   0x3   :  { %s59_s8 = smov [#allocation0]  }
   0x4   :  { %s26_s9 = sshll.u32 %s59_s8, 4  ;;  %s27_s9 = int_to_ptr.vmem [resolvable:$true] %s26_s9 }
   0x5   :  { %s34_s10 = scalar_lea.vmem %s27_s9, 32  ;;  %p39_p1 = scmp.lt.s32.totalorder %s27_s9, %s27_s9 }
   0x6   :  { %p35_p0 = scmp.ne.s32.totalorder %s27_s9, %s34_s10  ;;  %p40_p2 = scmp.lt.s32.totalorder %s34_s10, %s34_s10 }
   0x8   :  { %p41_p3 = por %p40_p2, %p39_p1 }
   0x9   :  { %v10_v1 = vld [vmem:[#allocation3] sm:$0x1]  }
   0xa   :  { %v7_v2 = vld [vmem:[#allocation3] sm:$0x1]   ;;  %11 = vrot.lane.b32.xlu0 %v10_v1, %s58_s0  ;;  %p42_p4 = pnand %p41_p3, %p35_p0 }
   0xb   :  { %9 = vst.msk [vmem:[#allocation2] sm:$0x1] %vm8_vm0, %v7_v2  }
  0x7c   :  { %v12_v3 = vpop.permute.xlu0 %11  }
  0x7d   :  { %15 = vst.msk [vmem:[#allocation2 + $0x1] sm:$0x1] %vm8_vm0, %v12_v3  }
  0x84   :  { %v19_v4 = vld [vmem:[#allocation2] sm:$0x3] }
  0x85   :  { %21 = vst [vmem:[#allocation0] sm:$0x3] %v19_v4 }
  0x86   :  { %45 = shalt.err (!%p42_p4)
}
  0x87   :  { %s46_s13 = scalar_lea.hbm %s86_s1, 32 }
  0x88   :  { %p47_p5 = scmp.ne.s32.totalorder %s86_s1, %s46_s13  ;;  %p50_p6 = scmp.lt.u32.totalorder %s46_s13, %s86_s1 }
  0x8a   :  { %p52_p7 = pnand %p50_p6, %p47_p5 }
  0x8c   :  { %55 = shalt.err (!%p52_p7)
}
  0x8d   :  { %29 = dma.vmem_to_hbm [thread:$0]  %s27_s9, 32, %s86_s1, [#allocation1]  }
  0x8e   :  { %56 = dma.done.wait [#allocation1], 32  }
  0x8f   :  { %57 = vsyncadd [#allocation1], 4294967264 }
  0x90   :  { %31 = vsyncpa [#allocation1], 1 }

// kernel: sac_critic_forward.1
= control target key start
LH: loop header
LB: loop body
LE: loop exit
PB: predicated region body
PF: predicated region fallthrough
CT: control target
= control target key end

     0   :  { %v398_v1 = vmov 0.0   ;;  %vm47_vm0 = vcmask 261120   ;;  %vm399_vm1 = vmmov 0   ;;  %s400_s21 = smov 32   ;;  %vm93_vm2 = vcmask 1043456   ;;  %s523_s1 = inlined_call_operand.vmem [shape: bf16[16,8], index: 1, kind: input, shape index: {}]   ;;  %s524_s2 = inlined_call_operand.vmem [shape: bf16[40,64], index: 2, kind: input, shape index: {}]   ;;  %s525_s0 = inlined_call_operand.vmem [shape: bf16[16,32], index: 0, kind: input, shape index: {}]   ;;  %s526_s4 = inlined_call_operand.vmem [shape: bf16[32,32], index: 4, kind: input, shape index: {}]   ;;  %s527_s6 = inlined_call_operand.vmem [shape: bf16[32,32], index: 6, kind: input, shape index: {}]   ;;  %s528_s3 = inlined_call_operand.vmem [shape: f32[1,64], index: 3, kind: input, shape index: {}]   ;;  %s529_s5 = inlined_call_operand.vmem [shape: f32[1,32], index: 5, kind: input, shape index: {}]   ;;  %s530_s8 = inlined_call_operand.vmem [shape: f32[1,32], index: 8, kind: input, shape index: {}]   ;;  %s531_s7 = inlined_call_operand.vmem [shape: f32[1,32], index: 7, kind: input, shape index: {}]   ;;  %s532_s9 = inlined_call_operand.vmem [shape: f32[1,32], index: 9, kind: input, shape index: {}]   ;;  %s533_s10 = inlined_call_operand.vmem [shape: f32[1,2], index: 10, kind: input, shape index: {}]   ;;  %s534_s11 = inlined_call_operand.vmem [shape: f32[16,2], index: 11, kind: output, shape index: {}]  }
   0x1   :  { %v389_v0 = vld [vmem:[%s523_s1] sm:$0xff]   ;;  %359 = vmatprep.subr.bf16.mxu0 %v398_v1  ;;  %369 = vmatprep.subr.bf16.mxu1 %v398_v1  ;;  %v392_v4 = vld [vmem:[%s524_s2 + $0x8] sm:$0xff]   ;;  %v393_v5 = vld [vmem:[%s524_s2 + $0x10] ss:$0 sps:$4 sm:$0xff]   ;;  %vm59_vm3 = vcmask 326912   ;;  %vm89_vm4 = vcmask 326656  }
   0x2   :  { %v390_v2 = vld [vmem:[%s524_s2] sm:$0xff]   ;;  %365 = vmatprep.mubr.msk.bf16.mxu0 %vm399_vm1, %v398_v1  ;;  %373 = vmatprep.mubr.msk.bf16.mxu1 %vm399_vm1, %v398_v1  ;;  %v95_v6 = vsel %vm93_vm2, %v393_v5, 0  ;;  %v395_v10 = vld [vmem:[%s526_s4 + $0x8] sm:$0xff]   ;;  %vm312_vm5 = vcmask 7168   ;;  %vm324_vm6 = vcmask 15360  }
   0x3   :  { %56 = vrot.lane.b32.xlu0 %v389_v0, %s400_s21  ;;  %v391_v3 = vld [vmem:[%s525_s0] sm:$0xff]   ;;  %360 = vmatpush3.bf16.msra.mxu0 %v390_v2  ;;  %v397_v22 = vld [vmem:[%s527_s6 + $0x8] sm:$0xff]  }
   0x4   :  { %48 = vst.msk [vmem:[#allocation2] sm:$0xff] %vm47_vm0, %v391_v3  ;;  %361 = vmatprep.subr.bf16.mxu0 %v398_v1  ;;  %v394_v9 = vld [vmem:[%s526_s4] sm:$0xff]   ;;  %s401_s4 = smov 96  }
   0x5   :  { %370 = vmatpush3.bf16.msra.mxu1 %v394_v9  ;;  %v333_v11 = vld [vmem:[%s528_s3] ss:$0 sm:$0xff] }
   0x6   :  { %371 = vmatprep.subr.bf16.mxu1 %v398_v1  ;;  %v396_v20 = vld [vmem:[%s527_s6] sm:$0xff]  }
   0x7   :  { %362 = vmatpush3.bf16.msra.mxu0 %v392_v4  ;;  %v338_v24 = vld [vmem:[%s529_s5] ss:$0 sm:$0xff] }
   0x8   :  { %363 = vmatprep.subr.bf16.mxu0 %v398_v1  ;;  %v346_v29 = vld [vmem:[%s530_s8] ss:$0 sm:$0xff] }
   0x9   :  { %372 = vmatpush3.bf16.msra.mxu1 %v395_v10  ;;  %v342_v38 = vld [vmem:[%s531_s7] ss:$0 sm:$0xff] }
   0xa   :  { %377 = vmatprep.subr.bf16.mxu1 %v398_v1  ;;  %v347_v43 = vld [vmem:[%s532_s9] ss:$0 sm:$0xff] }
   0xb   :  { %364 = vmatpush3.bf16.msra.mxu0 %v95_v6  ;;  %v348_v54 = vld [vmem:[%s533_s10] ss:$0 sm:$0xff] }
  0x75   :  { %v57_v7 = vpop.permute.xlu0 %56 }
  0x76   :  { %60 = vst.msk [vmem:[#allocation2] sm:$0xff] %vm59_vm3, %v57_v7 }
  0x7d   :  { %v61_v8 = vld [vmem:[#allocation2] sm:$0xff] }
  0x7e   :  { %366 = vmatmul.mubr.msk.bf16.vlgmr.msra.gmra.mrb[0].mxu0 %vm89_vm4, %v61_v8 }
 0x151   :  { %v131_v12 = vpop.f32.mrb[0].mxu0 }
 0x152   :  { %v132_v13 = vadd.f32 %v333_v11, %v131_v12  ;;  %v367_v14 = vpop.f32.mrb[1].mxu0 }
 0x153   :  { %v134_v15 = vpop.f32.mrb[2].mxu0 }
 0x154   :  { %v135_v16 = vadd.f32 %v333_v11, %v134_v15  ;;  %v368_v17 = vpop.f32.mrb[3].mxu0  ;;  %v138_v18 = vmax.f32 %v132_v13, 0.0 }
 0x156   :  { %v139_v19 = vmax.f32 %v135_v16, 0.0 }
 0x158   :  { %v140_v21 = vpack.c.bf16 %v139_v19, %v138_v18 }
 0x15a   :  { %222 = vrot.lane.b32.xlu0 %v140_v21, %s401_s4  ;;  %374 = vmatmul.mubr.msk.bf16.vlgmr.msra.gmra.mrb[0].mxu1 %vm47_vm0, %v140_v21 }
 0x15b   :  { %378 = vmatpush3.bf16.msra.mxu1 %v396_v20  ;;  %381 = vmatprep.mubr.msk.bf16.mxu1 %vm399_vm1, %v398_v1 }
 0x15c   :  { %379 = vmatprep.subr.bf16.mxu1 %v398_v1 }
 0x15f   :  { %380 = vmatpush3.bf16.msra.mxu1 %v397_v22 }
 0x1cc   :  { %v223_v23 = vpop.permute.xlu0 %222 }
 0x1cd   :  { %382 = vmatmul.mubr.msk.bf16.vlgmr.msra.gmra.mrb[4].mxu1 %vm47_vm0, %v223_v23 }
 0x22d   :  { %v201_v25 = vpop.f32.mrb[0].mxu1 }
 0x22e   :  { %v202_v26 = vadd.f32 %v338_v24, %v201_v25  ;;  %v375_v27 = vpop.f32.mrb[1].mxu1 }
 0x22f   :  { %v204_v28 = vpop.f32.mrb[2].mxu1 }
 0x230   :  { %v208_v30 = vmax.f32 %v202_v26, 0.0  ;;  %v205_v31 = vadd.f32 %v338_v24, %v204_v28  ;;  %v376_v32 = vpop.f32.mrb[3].mxu1 }
 0x232   :  { %v209_v33 = vmax.f32 %v205_v31, 0.0  ;;  %v289_v34 = vmul.f32 %v346_v29, %v208_v30 }
 0x234   :  { %v291_v35 = vsel %vm47_vm0, %v289_v34, 0.0  ;;  %v290_v36 = vmul.f32 %v346_v29, %v209_v33 }
 0x235   :  { %292 = vadd.xlane.f32.xlu1 %v291_v35 }
 0x236   :  { %v294_v37 = vsel %vm47_vm0, %v290_v36, 0.0 }
 0x239   :  { %295 = vadd.xlane.f32.xlu1 %v294_v37 }
 0x2a0   :  { %v273_v39 = vpop.f32.mrb[4].mxu1 }
 0x2a1   :  { %v274_v40 = vadd.f32 %v342_v38, %v273_v39  ;;  %v383_v41 = vpop.f32.mrb[5].mxu1 }
 0x2a2   :  { %v276_v42 = vpop.f32.mrb[6].mxu1 }
 0x2a3   :  { %v280_v44 = vmax.f32 %v274_v40, 0.0  ;;  %v277_v45 = vadd.f32 %v342_v38, %v276_v42  ;;  %v384_v46 = vpop.f32.mrb[7].mxu1 }
 0x2a5   :  { %v281_v47 = vmax.f32 %v277_v45, 0.0  ;;  %v304_v48 = vmul.f32 %v347_v43, %v280_v44 }
 0x2a7   :  { %v306_v49 = vsel %vm47_vm0, %v304_v48, 0.0  ;;  %v305_v50 = vmul.f32 %v347_v43, %v281_v47 }
 0x2a8   :  { %307 = vadd.xlane.f32.xlu0 %v306_v49 }
 0x2a9   :  { %v309_v51 = vsel %vm47_vm0, %v305_v50, 0.0 }
 0x2aa   :  { %310 = vadd.xlane.f32.xlu1 %v309_v51 }
 0x2c2   :  { %v293_v52 = vpop.xlane.xlu1 %292 }
 0x2c6   :  { %v296_v53 = vpop.xlane.xlu1 %295 }
 0x335   :  { %v308_v55 = vpop.xlane.xlu0 %307 }
 0x336   :  { %v313_v56 = vsel %vm312_vm5, %v293_v52, %v308_v55 }
 0x337   :  { %v322_v57 = vadd.f32 %v348_v54, %v313_v56  ;;  %v311_v58 = vpop.xlane.xlu1 %310 }
 0x338   :  { %v314_v59 = vsel %vm312_vm5, %v296_v53, %v311_v58 }
 0x339   :  { %325 = vst.msk [vmem:[%s534_s11] sm:$0xff] %vm324_vm6, %v322_v57  ;;  %v323_v60 = vadd.f32 %v348_v54, %v314_v59 }
 0x33b   :  { %326 = vst.msk [vmem:[%s534_s11 + $0x8] sm:$0xff] %vm324_vm6, %v323_v60 }

</bundles_post_ra>
